<compile_context>
chip_gen: v7x
topology: tpu7x:2x2x1
jax: 0.10.0
libtpu: 0.0.40
codegen_flags: <defaults>
</compile_context>

<pallas_src>
from functools import partial

import jax
import jax.numpy as jnp
from jax.experimental import pallas as pl
from jax.experimental.pallas import tpu as pltpu


def _round_up(n, m):
    return (n + m - 1) // m * m


def _cdiv(a, b):
    return -(-a // b)


def _sublane_align(dtype):
    # Minimum packed sublane count: 8 rows (4-byte), 16 (2-byte), 32 (1-byte).
    return {4: 8, 2: 16, 1: 32}.get(jnp.dtype(dtype).itemsize, 8)


def _choose_tile_m(M, tile_m, dtype):
    """Pick the per-step row tile.

    * Rounds to the dtype's sublane pack so blocks stay packed (no 8-row bf16 tiles).
    * Sizes the tile so the last grid step is (nearly) full -> minimal wasted HBM
      traffic on this bandwidth-bound kernel (e.g. M=300 no longer pads 212 rows).
    * Guarantees >= 2 grid steps whenever M allows, so the "parallel" grid axis can
      be sharded across v7x's two TensorCores (no-op cost on v5e/v6e).
    """
    align = _sublane_align(dtype)
    tile_m = max(align, _round_up(tile_m, align))
    if M <= align:
        return align
    n_steps = _cdiv(M, tile_m)
    n_steps = max(n_steps, min(2, _cdiv(M, align)))
    return _round_up(_cdiv(M, n_steps), align)


def _vmem_capacity_bytes():
    """Physical VMEM of the current generation (64 MiB v7x, 128 MiB v5e/v6e)."""
    try:
        info = pltpu.get_tpu_info()
        cap = getattr(info, "vmem_capacity_bytes", None)
        if cap:
            return int(cap)
    except Exception:
        pass
    return 64 * 2**20  # conservative fallback (v7x-sized)


def adapter_kernel(x_ref, wd_ref, bd_ref, wu_ref, bu_ref, gamma_ref, beta_ref,
                   mask_ref, o_ref, *, hidden_size, mask_cols):
    # x_ref:     (TM, Hp)  tile of input rows (native dtype; bf16 stays bf16)
    # wd_ref:    (Hp, Bp)  down-projection weight, (in, out) layout, zero-padded
    # bd_ref:    (1, Bp)   down-projection bias (f32)
    # wu_ref:    (Bp, Hp)  up-projection weight, (in, out) layout, zero-padded
    # bu_ref:    (1, Hp)   up-projection bias (f32)
    # gamma_ref: (1, Hp)   LayerNorm weight (f32; zero in padded cols)
    # beta_ref:  (1, Hp)   LayerNorm bias   (f32; zero in padded cols)
    # mask_ref:  (1, Hp)   f32 column mask (1.0 for real cols); unread if not mask_cols
    # o_ref:     (TM, Hp)  output tile
    x = x_ref[...]  # native dtype feeds the MXU at full rate

    # down-projection (+bias) + ReLU; f32 accumulation on the MXU
    h = jnp.dot(x, wd_ref[...], preferred_element_type=jnp.float32)
    h = jnp.maximum(h + bd_ref[...], 0.0)

    # up-projection (+bias); cast activations back to the weight dtype for the MXU
    u = jnp.dot(h.astype(wu_ref.dtype), wu_ref[...], preferred_element_type=jnp.float32)
    u = u + bu_ref[...]

    # dropout (eval mode) -> identity; residual add in f32
    r = x.astype(jnp.float32) + u

    # LayerNorm over the *real* hidden columns.  Padded columns of r are exactly 0,
    # so sums over the padded width equal sums over the real width; centering is
    # masked with a precomputed column mask (no per-step iota/compare/where).
    inv_h = 1.0 / hidden_size
    mean = jnp.sum(r, axis=-1, keepdims=True) * inv_h
    centered = r - mean
    if mask_cols:
        centered = centered * mask_ref[...]
    var = jnp.sum(centered * centered, axis=-1, keepdims=True) * inv_h
    y = centered * jax.lax.rsqrt(var + 1e-5)  # eps = 1e-5 (PyTorch default)
    y = y * gamma_ref[...] + beta_ref[...]

    o_ref[...] = y.astype(o_ref.dtype)


def prepare_adapter_params(w_down, b_down, w_up, b_up, gamma, beta, weight_dtype=None):
    """One-time parameter prep (call once, not per step):
      * transpose Linear weights to (in, out) layout,
      * zero-pad hidden/bottleneck dims up to multiples of 128 (lane-dense),
      * pre-cast biases/gamma/beta (and the LayerNorm column mask) to f32,
      * optionally cast the two weight matrices to `weight_dtype` (e.g. bf16) —
        MXU still accumulates in f32; halves resident weight VMEM / HBM traffic.

    PyTorch layout in: w_down (B, H), w_up (H, B).
    Returns (wd_t, bd, wu_t, bu, gamma, beta, mask).
    """
    B, H = w_down.shape
    Hp = _round_up(H, 128)
    Bp = _round_up(B, 128)
    wd_t = jnp.pad(w_down.T, ((0, Hp - H), (0, Bp - B)))        # (Hp, Bp)
    wu_t = jnp.pad(w_up.T, ((0, Bp - B), (0, Hp - H)))          # (Bp, Hp)
    if weight_dtype is not None:
        wd_t = wd_t.astype(weight_dtype)
        wu_t = wu_t.astype(weight_dtype)
    bd = jnp.pad(b_down.astype(jnp.float32), (0, Bp - B)).reshape(1, Bp)
    bu = jnp.pad(b_up.astype(jnp.float32), (0, Hp - H)).reshape(1, Hp)
    g = jnp.pad(gamma.astype(jnp.float32), (0, Hp - H)).reshape(1, Hp)
    be = jnp.pad(beta.astype(jnp.float32), (0, Hp - H)).reshape(1, Hp)
    mask = (jnp.arange(Hp) < H).astype(jnp.float32).reshape(1, Hp)
    return wd_t, bd, wu_t, bu, g, be, mask


def _resident_spec(shape):
    # Constant index map -> fetched once; single-buffer it (no dead second copy).
    return pl.BlockSpec(shape, lambda i: (0, 0), pipeline_mode=pl.Buffered(1))


@partial(jax.jit, static_argnames=("tile_m",))
def adapter_forward(x, wd_t, bd, wu_t, bu, gamma, beta, mask, *, tile_m=512):
    """x: (..., H). Params must come from prepare_adapter_params().

    tile_m: requested rows per grid step (default 512; the kernel is HBM-bound so
    bigger streamed tiles -> closer to the HBM roofline).  The actual tile is
    re-derived per call: sublane-aligned, last-tile-full, and >= 2 grid steps when
    M allows (v7x megacore).
    """
    orig_shape = x.shape
    H = orig_shape[-1]
    Hp, Bp = wd_t.shape
    x2d = x.reshape(-1, H)
    M = x2d.shape[0]

    tm = _choose_tile_m(M, tile_m, x.dtype)
    Mp = _round_up(M, tm)

    xp = x2d
    if Mp != M or Hp != H:
        xp = jnp.pad(x2d, ((0, Mp - M), (0, Hp - H)))

    grid = (Mp // tm,)

    # VMEM budget with per-array dtype sizes:
    #   double-buffered x/out tiles + single-buffered resident params + f32 temps.
    x_bytes = jnp.dtype(x.dtype).itemsize
    w_bytes = jnp.dtype(wd_t.dtype).itemsize
    stream = 2 * 2 * tm * Hp * x_bytes                       # x + out, 2 buffers each
    params_bytes = (Hp * Bp + Bp * Hp) * w_bytes + (Bp + 4 * Hp) * 4
    scratch = (3 * tm * Hp + tm * Bp) * 4                    # f32 body temporaries
    est = stream + params_bytes + scratch

    cap = _vmem_capacity_bytes()
    # ~25% headroom for compiler-internal scratch: never ask for all of v7x's
    # 64 MiB; on v5e/v6e (128 MiB) this allows well above the old 64 MiB cap.
    vmem_limit = int(min(int(cap * 0.75), max(32 * 2**20, int(est * 1.5))))

    out = pl.pallas_call(
        partial(adapter_kernel, hidden_size=H, mask_cols=(Hp != H)),
        out_shape=jax.ShapeDtypeStruct((Mp, Hp), x.dtype),
        grid_spec=pltpu.PrefetchScalarGridSpec(
            num_scalar_prefetch=0,
            grid=grid,
            in_specs=[
                # x rows (streamed; default double-buffering.  If profiling shows
                # exposed DMA, bump to pipeline_mode=pl.Buffered(3)).
                pl.BlockSpec((tm, Hp), lambda i: (i, 0)),
                _resident_spec((Hp, Bp)),   # w_down^T
                _resident_spec((1, Bp)),    # b_down
                _resident_spec((Bp, Hp)),   # w_up^T
                _resident_spec((1, Hp)),    # b_up
                _resident_spec((1, Hp)),    # gamma
                _resident_spec((1, Hp)),    # beta
                _resident_spec((1, Hp)),    # LayerNorm column mask
            ],
            out_specs=pl.BlockSpec((tm, Hp), lambda i: (i, 0)),
        ),
        compiler_params=pltpu.CompilerParams(
            dimension_semantics=("parallel",),
            vmem_limit_bytes=vmem_limit,
        ),
    )(xp, wd_t, bd, wu_t, bu, gamma, beta, mask)

    return out[:M, :H].reshape(orig_shape)


def reference_forward(x, w_down, b_down, w_up, b_up, gamma, beta):
    h = jnp.maximum(x @ w_down.T + b_down, 0.0)
    u = h @ w_up.T + b_up
    r = x + u
    mean = jnp.mean(r, axis=-1, keepdims=True)
    var = jnp.mean((r - mean) ** 2, axis=-1, keepdims=True)
    return (r - mean) / jnp.sqrt(var + 1e-5) * gamma + beta


if __name__ == "__main__":
    key = jax.random.PRNGKey(0)
    batch, seq, hidden, bottleneck = 2, 8, 32, 64

    k_x, k_wd, k_bd, k_wu, k_bu = jax.random.split(key, 5)

    x = jax.random.normal(k_x, (batch, seq, hidden), dtype=jnp.float32)

    # Deterministic parameter init (uniform in +/- 1/sqrt(fan_in), like nn.Linear).
    bd_lim = 1.0 / (hidden ** 0.5)
    bu_lim = 1.0 / (bottleneck ** 0.5)
    w_down = jax.random.uniform(k_wd, (bottleneck, hidden), jnp.float32, -bd_lim, bd_lim)
    b_down = jax.random.uniform(k_bd, (bottleneck,), jnp.float32, -bd_lim, bd_lim)
    w_up = jax.random.uniform(k_wu, (hidden, bottleneck), jnp.float32, -bu_lim, bu_lim)
    b_up = jax.random.uniform(k_bu, (hidden,), jnp.float32, -bu_lim, bu_lim)
    gamma = jnp.ones((hidden,), jnp.float32)
    beta = jnp.zeros((hidden,), jnp.float32)

    ref = reference_forward(x, w_down, b_down, w_up, b_up, gamma, beta)

    # f32 path (one-time parameter prep hoisted out of the call).
    params = prepare_adapter_params(w_down, b_down, w_up, b_up, gamma, beta)
    out = jax.block_until_ready(adapter_forward(x, *params))
    assert out.shape == x.shape
    assert jnp.allclose(out, ref, atol=1e-4, rtol=1e-4), "f32 mismatch vs reference"

    # bf16 I/O + bf16 weights path (f32 MXU accumulation) — the bandwidth-bound win.
    params_bf16 = prepare_adapter_params(w_down, b_down, w_up, b_up, gamma, beta,
                                         weight_dtype=jnp.bfloat16)
    out_bf16 = jax.block_until_ready(
        adapter_forward(x.astype(jnp.bfloat16), *params_bf16))
    assert out_bf16.shape == x.shape
    assert jnp.allclose(out_bf16.astype(jnp.float32), ref, atol=1e-1, rtol=1e-1), \
        "bf16 mismatch vs reference"

    print("KERNEL_OK")
</pallas_src>

<mosaic_0001>
module attributes {stable_mosaic.version = 11 : i64} {
  func.func @adapter_kernel(%arg0: i32, %arg1: memref<8x128xf32, #tpu.memory_space<vmem>>, %arg2: memref<128x128xf32, #tpu.memory_space<vmem>>, %arg3: memref<1x128xf32, #tpu.memory_space<vmem>>, %arg4: memref<128x128xf32, #tpu.memory_space<vmem>>, %arg5: memref<1x128xf32, #tpu.memory_space<vmem>>, %arg6: memref<1x128xf32, #tpu.memory_space<vmem>>, %arg7: memref<1x128xf32, #tpu.memory_space<vmem>>, %arg8: memref<1x128xf32, #tpu.memory_space<vmem>>, %arg9: memref<8x128xf32, #tpu.memory_space<vmem>>) attributes {dimension_semantics = [#tpu.dimension_semantics<parallel>], iteration_bounds = array<i64: 2>, scalar_prefetch = 0 : i64, scratch_operands = 0 : i64, tpu.core_type = #tpu.core_type<tc>, window_params = [{transform_indices = @transform_0, window_bounds = array<i64: 8, 128>}, {pipeline_mode = #tpu.pipeline_mode<synchronous>, transform_indices = @transform_1, window_bounds = array<i64: 128, 128>}, {pipeline_mode = #tpu.pipeline_mode<synchronous>, transform_indices = @transform_2, window_bounds = array<i64: 1, 128>}, {pipeline_mode = #tpu.pipeline_mode<synchronous>, transform_indices = @transform_3, window_bounds = array<i64: 128, 128>}, {pipeline_mode = #tpu.pipeline_mode<synchronous>, transform_indices = @transform_4, window_bounds = array<i64: 1, 128>}, {pipeline_mode = #tpu.pipeline_mode<synchronous>, transform_indices = @transform_5, window_bounds = array<i64: 1, 128>}, {pipeline_mode = #tpu.pipeline_mode<synchronous>, transform_indices = @transform_6, window_bounds = array<i64: 1, 128>}, {pipeline_mode = #tpu.pipeline_mode<synchronous>, transform_indices = @transform_7, window_bounds = array<i64: 1, 128>}, {transform_indices = @transform_8, window_bounds = array<i64: 8, 128>}]} {
    %c0 = arith.constant 0 : index
    %c0_0 = arith.constant 0 : index
    %0 = vector.load %arg1[%c0, %c0_0] : memref<8x128xf32, #tpu.memory_space<vmem>>, vector<8x128xf32>
    %c0_1 = arith.constant 0 : index
    %c0_2 = arith.constant 0 : index
    %1 = vector.load %arg2[%c0_1, %c0_2] : memref<128x128xf32, #tpu.memory_space<vmem>>, vector<128x128xf32>
    %cst = arith.constant dense<0.000000e+00> : vector<8x128xf32>
    %2 = tpu.matmul %0, %1, %cst {dimension_numbers = #tpu.dot_dimension_numbers<[1], [0], [0], [1], [0, 0, 1, 1], [], []>} : vector<8x128xf32>, vector<128x128xf32>, vector<8x128xf32> -> vector<8x128xf32>
    %c0_3 = arith.constant 0 : index
    %c0_4 = arith.constant 0 : index
    %3 = vector.load %arg3[%c0_3, %c0_4] : memref<1x128xf32, #tpu.memory_space<vmem>>, vector<1x128xf32>
    %4 = vector.broadcast %3 : vector<1x128xf32> to vector<8x128xf32>
    %5 = arith.addf %2, %4 : vector<8x128xf32>
    %cst_5 = arith.constant 0.000000e+00 : f32
    %6 = vector.broadcast %cst_5 : f32 to vector<8x128xf32>
    %7 = arith.maximumf %5, %6 : vector<8x128xf32>
    %c0_6 = arith.constant 0 : index
    %c0_7 = arith.constant 0 : index
    %8 = vector.load %arg4[%c0_6, %c0_7] : memref<128x128xf32, #tpu.memory_space<vmem>>, vector<128x128xf32>
    %cst_8 = arith.constant dense<0.000000e+00> : vector<8x128xf32>
    %9 = tpu.matmul %7, %8, %cst_8 {dimension_numbers = #tpu.dot_dimension_numbers<[1], [0], [0], [1], [0, 0, 1, 1], [], []>} : vector<8x128xf32>, vector<128x128xf32>, vector<8x128xf32> -> vector<8x128xf32>
    %c0_9 = arith.constant 0 : index
    %c0_10 = arith.constant 0 : index
    %10 = vector.load %arg5[%c0_9, %c0_10] : memref<1x128xf32, #tpu.memory_space<vmem>>, vector<1x128xf32>
    %11 = vector.broadcast %10 : vector<1x128xf32> to vector<8x128xf32>
    %12 = arith.addf %9, %11 : vector<8x128xf32>
    %13 = arith.addf %0, %12 : vector<8x128xf32>
    %cst_11 = arith.constant dense<0.000000e+00> : vector<8xf32>
    %14 = vector.multi_reduction <add>, %13, %cst_11 [1] : vector<8x128xf32> to vector<8xf32>
    %15 = vector.shape_cast %14 : vector<8xf32> to vector<8x1xf32>
    %cst_12 = arith.constant 3.125000e-02 : f32
    %16 = vector.broadcast %cst_12 : f32 to vector<8x1xf32>
    %17 = arith.mulf %15, %16 : vector<8x1xf32>
    %18 = vector.broadcast %17 : vector<8x1xf32> to vector<8x128xf32>
    %19 = arith.subf %13, %18 : vector<8x128xf32>
    %c0_13 = arith.constant 0 : index
    %c0_14 = arith.constant 0 : index
    %20 = vector.load %arg8[%c0_13, %c0_14] : memref<1x128xf32, #tpu.memory_space<vmem>>, vector<1x128xf32>
    %21 = vector.broadcast %20 : vector<1x128xf32> to vector<8x128xf32>
    %22 = arith.mulf %19, %21 : vector<8x128xf32>
    %23 = arith.mulf %22, %22 : vector<8x128xf32>
    %cst_15 = arith.constant dense<0.000000e+00> : vector<8xf32>
    %24 = vector.multi_reduction <add>, %23, %cst_15 [1] : vector<8x128xf32> to vector<8xf32>
    %25 = vector.shape_cast %24 : vector<8xf32> to vector<8x1xf32>
    %cst_16 = arith.constant 3.125000e-02 : f32
    %26 = vector.broadcast %cst_16 : f32 to vector<8x1xf32>
    %27 = arith.mulf %25, %26 : vector<8x1xf32>
    %cst_17 = arith.constant 9.99999974E-6 : f32
    %28 = vector.broadcast %cst_17 : f32 to vector<8x1xf32>
    %29 = arith.addf %27, %28 : vector<8x1xf32>
    %30 = math.rsqrt %29 : vector<8x1xf32>
    %31 = vector.broadcast %30 : vector<8x1xf32> to vector<8x128xf32>
    %32 = arith.mulf %22, %31 : vector<8x128xf32>
    %c0_18 = arith.constant 0 : index
    %c0_19 = arith.constant 0 : index
    %33 = vector.load %arg6[%c0_18, %c0_19] : memref<1x128xf32, #tpu.memory_space<vmem>>, vector<1x128xf32>
    %34 = vector.broadcast %33 : vector<1x128xf32> to vector<8x128xf32>
    %35 = arith.mulf %32, %34 : vector<8x128xf32>
    %c0_20 = arith.constant 0 : index
    %c0_21 = arith.constant 0 : index
    %36 = vector.load %arg7[%c0_20, %c0_21] : memref<1x128xf32, #tpu.memory_space<vmem>>, vector<1x128xf32>
    %37 = vector.broadcast %36 : vector<1x128xf32> to vector<8x128xf32>
    %38 = arith.addf %35, %37 : vector<8x128xf32>
    %c0_22 = arith.constant 0 : index
    %c0_23 = arith.constant 0 : index
    %39 = vector.load %arg9[%c0_22, %c0_23] : memref<8x128xf32, #tpu.memory_space<vmem>>, vector<8x128xf32>
    tpu.vector_store %arg9[%c0_22, %c0_23], %38 {strides = array<i32>} : memref<8x128xf32, #tpu.memory_space<vmem>>, vector<8x128xf32>,
    return
  }
  func.func @transform_0(%arg0: i32) -> (i32, i32) {
    %c0_i32 = arith.constant 0 : i32
    %c0_i32_0 = arith.constant 0 : i32
    return %arg0, %c0_i32 : i32, i32
  }
  func.func @transform_1(%arg0: i32) -> (i32, i32) {
    %c0_i32 = arith.constant 0 : i32
    %c0_i32_0 = arith.constant 0 : i32
    %c0_i32_1 = arith.constant 0 : i32
    return %c0_i32, %c0_i32_0 : i32, i32
  }
  func.func @transform_2(%arg0: i32) -> (i32, i32) {
    %c0_i32 = arith.constant 0 : i32
    %c0_i32_0 = arith.constant 0 : i32
    %c0_i32_1 = arith.constant 0 : i32
    return %c0_i32, %c0_i32_0 : i32, i32
  }
  func.func @transform_3(%arg0: i32) -> (i32, i32) {
    %c0_i32 = arith.constant 0 : i32
    %c0_i32_0 = arith.constant 0 : i32
    %c0_i32_1 = arith.constant 0 : i32
    return %c0_i32, %c0_i32_0 : i32, i32
  }
  func.func @transform_4(%arg0: i32) -> (i32, i32) {
    %c0_i32 = arith.constant 0 : i32
    %c0_i32_0 = arith.constant 0 : i32
    %c0_i32_1 = arith.constant 0 : i32
    return %c0_i32, %c0_i32_0 : i32, i32
  }
  func.func @transform_5(%arg0: i32) -> (i32, i32) {
    %c0_i32 = arith.constant 0 : i32
    %c0_i32_0 = arith.constant 0 : i32
    %c0_i32_1 = arith.constant 0 : i32
    return %c0_i32, %c0_i32_0 : i32, i32
  }
  func.func @transform_6(%arg0: i32) -> (i32, i32) {
    %c0_i32 = arith.constant 0 : i32
    %c0_i32_0 = arith.constant 0 : i32
    %c0_i32_1 = arith.constant 0 : i32
    return %c0_i32, %c0_i32_0 : i32, i32
  }
  func.func @transform_7(%arg0: i32) -> (i32, i32) {
    %c0_i32 = arith.constant 0 : i32
    %c0_i32_0 = arith.constant 0 : i32
    %c0_i32_1 = arith.constant 0 : i32
    return %c0_i32, %c0_i32_0 : i32, i32
  }
  func.func @transform_8(%arg0: i32) -> (i32, i32) {
    %c0_i32 = arith.constant 0 : i32
    %c0_i32_0 = arith.constant 0 : i32
    return %arg0, %c0_i32 : i32, i32
  }
}

</mosaic_0001>

<bundles_post_ra>
// kernel: adapter_forward.1
= control target key start
LH: loop header
LB: loop body
LE: loop exit
PB: predicated region body
PF: predicated region fallthrough
CT: control target
= control target key end

     0   :  { %13 = vsyncpa [#allocation3], 0  ;;  %s1092_s0 = inlined_call_operand.vmem [shape: f32[16,128], index: 0, kind: input, shape index: {}]   ;;  %s1093_s1 = inlined_call_operand.hbm [shape: f32[128,128], index: 1, kind: input, shape index: {}]   ;;  %s1094_s2 = inlined_call_operand.vmem [shape: f32[1,128], index: 2, kind: input, shape index: {}]   ;;  %s1095_s3 = inlined_call_operand.hbm [shape: f32[128,128], index: 3, kind: input, shape index: {}]   ;;  %s1096_s4 = inlined_call_operand.vmem [shape: f32[1,128], index: 4, kind: input, shape index: {}]   ;;  %s1097_s5 = inlined_call_operand.vmem [shape: f32[1,128], index: 5, kind: input, shape index: {}]   ;;  %s1098_s6 = inlined_call_operand.vmem [shape: f32[1,128], index: 6, kind: input, shape index: {}]   ;;  %s1099_s7 = inlined_call_operand.vmem [shape: f32[1,128], index: 7, kind: input, shape index: {}]   ;;  %s1100_s8 = inlined_call_operand.vmem [shape: f32[16,128], index: 8, kind: output, shape index: {}]  }
   0x1   :  { %14 = vsyncpa [#allocation5], 0  ;;  %s961_s27 = smov 0  }
   0x2 LB: > { %s967_s28 = sadd.s32 4294967295, %s907_s27   ;;  %p633_p0 = scmp.ge.s32.totalorder %s907_s27, 1  ;;  %s907_s27 = sphi %s961_s27, %s20_s27  }
   0x3   : > { %p224_p1 = scmp.lt.s32.totalorder %s907_s27, 3  ;;  %s909_s29 = smov [#allocation2]  }
   0x4   : > { %s236_s30 = sshll.u32 %s909_s29, 4  ;;  %p1101_p3 = scmp.eq.s32.totalorder %s967_s28, 0  ;;  %s237_s30 = int_to_ptr.vmem [resolvable:$true] %s236_s30 }
   0x5   : > { %p971_p2 = pnand %p633_p0, %p224_p1  ;;  %s910_s10 = smov [#allocation4]  }
   0x6   : > { %s252_s11 = sshll.u32 %s910_s10, 4  ;;  %s837_s15 = scalar_lea.hbm %s1093_s1, 2048  ;;  %s984_s11 = int_to_ptr.vmem [resolvable:$true] %s252_s11 }
   0x7   : > { %s1103_s9 = scalar_select %p971_p2, 1, 0 }
   0x8   : > { %p809_p4 = pneg %p971_p2  ;;  %p838_p6 = scmp.ne.s32.totalorder %s1093_s1, %s837_s15 }
   0x9   : > { %p844_p10 = scmp.lt.u32.totalorder %s837_s15, %s1093_s1 }
   0xa   : > { %p980_p5 = pnand %p1101_p3, %p809_p4 }
   0xc   : > { %p839_p7 = pneg %p980_p5 }
   0xe   : > { %p840_p8 = pnand %p839_p7, %p838_p6 }
  0x10   : > { %p841_p9 = pneg %p840_p8 }
  0x12   : > { %p846_p11 = pnand %p844_p10, %p841_p9 }
  0x14   : > { %849 = shalt.err (!%p846_p11)
}
  0x15   : > { %s850_s20 = scalar_lea.vmem %s237_s30, 2048  ;;  %p858_p1 = scmp.lt.s32.totalorder %s237_s30, %s237_s30 }
  0x16   : > { %p851_p12 = scmp.ne.s32.totalorder %s237_s30, %s850_s20  ;;  %p859_p4 = scmp.lt.s32.totalorder %s850_s20, %s850_s20 }
  0x18   : > { %p853_p13 = pnand %p851_p12, %p839_p7  ;;  %p860_p3 = por %p859_p4, %p858_p1 }
  0x1a   : > { %p854_p0 = pneg %p853_p13 }
  0x1c   : > { %p861_p2 = pnand %p860_p3, %p854_p0 }
  0x1e   : > { %864 = shalt.err (!%p861_p2)
}
  0x1f   : > { %s911_s21 = smov 128   ;;  %s912_s22 = smov 8  }
  0x20   : > { %812 = dma.hbm_to_vmem [thread:$0]  (!%p980_p5), %s1093_s1, 2048, %s237_s30, [#allocation3], %s911_s21, %s911_s21, %s912_s22  }
  0x21   : > { %s865_s29 = scalar_lea.hbm %s1095_s3, 2048 }
  0x22   : > { %p866_p6 = scmp.ne.s32.totalorder %s1095_s3, %s865_s29  ;;  %p872_p8 = scmp.lt.u32.totalorder %s865_s29, %s1095_s3 }
  0x24   : > { %p868_p2 = pnand %p866_p6, %p839_p7 }
  0x26   : > { %p869_p3 = pneg %p868_p2 }
  0x28   : > { %p874_p9 = pnand %p872_p8, %p869_p3 }
  0x2a   : > { %877 = shalt.err (!%p874_p9)
}
  0x2b   : > { %s878_s30 = scalar_lea.vmem %s984_s11, 2048  ;;  %p886_p13 = scmp.lt.s32.totalorder %s984_s11, %s984_s11 }
  0x2c   : > { %p879_p10 = scmp.ne.s32.totalorder %s984_s11, %s878_s30  ;;  %p887_p0 = scmp.lt.s32.totalorder %s878_s30, %s878_s30 }
  0x2e   : > { %p881_p11 = pnand %p879_p10, %p839_p7  ;;  %p888_p1 = por %p887_p0, %p886_p13 }
  0x30   : > { %p882_p12 = pneg %p881_p11 }
  0x32   : > { %p889_p4 = pnand %p888_p1, %p882_p12 }
  0x34   : > { %892 = shalt.err (!%p889_p4)
}
  0x35   : > { %815 = dma.hbm_to_vmem [thread:$0]  (!%p980_p5), %s1095_s3, 2048, %s984_s11, [#allocation5], %s911_s21, %s911_s21, %s912_s22  }
  0x36   : > { %p1105_p6 = scmp.ne.s32.totalorder %s1103_s9, 0 }
  0x37   : > { %p1106_p2 = scmp.eq.s32.totalorder (!%p1105_p6), %s967_s28, 0 }
  0x38   : > { %287 = sbr.rel (%p1105_p6) target bundleno = 847 (0x34f), region = 52 }
  0x3f   : > { %898 = dma.done.wait (%p1106_p2), [#allocation3], 2048   ;;  %p1107_p7 = pmov %p1106_p2 }
  0x40   : > { %p1108_p3 = pmov %p1106_p2 }
  0x41   : > { %900 = vsyncadd (%p1107_p7), [#allocation3], 4294965248 }
  0x42   : > { %902 = dma.done.wait (%p1108_p3), [#allocation5], 2048   ;;  %p1109_p8 = pmov %p1106_p2 }
  0x43   : > { %v913_v0 = vmov 0.0|0.0   ;;  %vm914_vm0 = vmmov 0   ;;  %v915_v1 = vmov 0.0   ;;  %v332_v2 = vld [vmem:[#allocation2] sm:$0xff]  ;;  %v333_v3 = vld [vmem:[#allocation2 + $0x8] sm:$0xff]  ;;  %v334_v4 = vld [vmem:[#allocation2 + $0x10] sm:$0xff] }
  0x44   : > { %904 = vsyncadd (%p1109_p8), [#allocation5], 4294965248  ;;  %753 = vmatprep.subr.bf16.mxu0 %v913_v0  ;;  %715 = vmatprep.mubr.msk.f32.mxu0 %vm914_vm0, %v915_v1  ;;  %v754_v5 = vpack.c.bf16 %v333_v3, %v332_v2  ;;  %v335_v6 = vld [vmem:[#allocation2 + $0x18] sm:$0xff]  ;;  %v336_v8 = vld [vmem:[#allocation2 + $0x20] sm:$0xff]  ;;  %p323_p5 = scmp.lt.s32.totalorder %s967_s28, 1 }
  0x45   : > { %777 = vmatprep.subr.bf16.mxu1 %v913_v0  ;;  %750 = vmatprep.mubr.msk.f32.mxu1 %vm914_vm0, %v915_v1  ;;  %v757_v7 = vpack.c.bf16 %v335_v6, %v334_v4  ;;  %v337_v9 = vld [vmem:[#allocation2 + $0x28] sm:$0xff]  ;;  %v426_v10 = vld [vmem:[#allocation4] sm:$0xff]  ;;  %v428_v12 = vld [vmem:[#allocation4 + $0x10] sm:$0xff] }
  0x46   : > { %755 = vmatpush3.bf16.msra.mxu0 %v754_v5  ;;  %v427_v11 = vld [vmem:[#allocation4 + $0x8] sm:$0xff]  ;;  %v429_v13 = vld [vmem:[#allocation4 + $0x18] sm:$0xff]  ;;  %v760_v14 = vpack.c.bf16 %v337_v9, %v336_v8  ;;  %v338_v16 = vld [vmem:[#allocation2 + $0x30] sm:$0xff]  ;;  %s1111_s28 = smov (!%p323_p5, %s967_s28), 1 }
  0x47   : > { %756 = vmatprep.subr.bf16.mxu0 %v913_v0  ;;  %v778_v15 = vpack.c.bf16 %v427_v11, %v426_v10  ;;  %v339_v17 = vld [vmem:[#allocation2 + $0x38] sm:$0xff]  ;;  %v781_v18 = vpack.c.bf16 %v429_v13, %v428_v12  ;;  %v430_v19 = vld [vmem:[#allocation4 + $0x20] sm:$0xff]  ;;  %v431_v20 = vld [vmem:[#allocation4 + $0x28] sm:$0xff]  ;;  %s640_s9 = sshll.u32 %s1111_s28, 3 }
  0x48   : > { %v763_v21 = vpack.c.bf16 %v339_v17, %v338_v16  ;;  %v340_v22 = vld [vmem:[#allocation2 + $0x40] sm:$0xff]  ;;  %v341_v23 = vld [vmem:[#allocation2 + $0x48] sm:$0xff]  ;;  %v784_v24 = vpack.c.bf16 %v431_v20, %v430_v19  ;;  %v432_v25 = vld [vmem:[#allocation4 + $0x30] sm:$0xff]  ;;  %s326_s18 = scalar_lea.vmem %s1092_s0, %s640_s9  ;;  %s330_s15 = scalar_lea.vmem %s1100_s8, %s640_s9 }
  0x49   : > { %779 = vmatpush3.bf16.msra.mxu1 %v778_v15  ;;  %v433_v26 = vld [vmem:[#allocation4 + $0x38] sm:$0xff]  ;;  %v766_v27 = vpack.c.bf16 %v341_v23, %v340_v22  ;;  %v342_v28 = vld [vmem:[#allocation2 + $0x50] sm:$0xff]  ;;  %v434_v31 = vld [vmem:[#allocation4 + $0x40] sm:$0xff] }
  0x4a   : > { %758 = vmatpush3.bf16.msra.mxu0 %v757_v7  ;;  %780 = vmatprep.subr.bf16.mxu1 %v913_v0  ;;  %v343_v29 = vld [vmem:[#allocation2 + $0x58] sm:$0xff]  ;;  %v787_v30 = vpack.c.bf16 %v433_v26, %v432_v25  ;;  %v435_v32 = vld [vmem:[#allocation4 + $0x48] sm:$0xff]  ;;  %v344_v34 = vld [vmem:[#allocation2 + $0x60] sm:$0xff] }
  0x4b   : > { %759 = vmatprep.subr.bf16.mxu0 %v913_v0  ;;  %v769_v33 = vpack.c.bf16 %v343_v29, %v342_v28  ;;  %v345_v35 = vld [vmem:[#allocation2 + $0x68] sm:$0xff]  ;;  %v790_v36 = vpack.c.bf16 %v435_v32, %v434_v31  ;;  %v436_v37 = vld [vmem:[#allocation4 + $0x50] sm:$0xff]  ;;  %v437_v38 = vld [vmem:[#allocation4 + $0x58] sm:$0xff] }
  0x4c   : > { %v772_v39 = vpack.c.bf16 %v345_v35, %v344_v34  ;;  %v346_v40 = vld [vmem:[#allocation2 + $0x70] sm:$0xff]  ;;  %v347_v41 = vld [vmem:[#allocation2 + $0x78] sm:$0xff]  ;;  %v793_v42 = vpack.c.bf16 %v437_v38, %v436_v37  ;;  %v438_v43 = vld [vmem:[#allocation4 + $0x60] sm:$0xff] }
  0x4d   : > { %782 = vmatpush3.bf16.msra.mxu1 %v781_v18  ;;  %v439_v44 = vld [vmem:[#allocation4 + $0x68] sm:$0xff]  ;;  %v775_v45 = vpack.c.bf16 %v347_v41, %v346_v40  ;;  %v331_v47 = vld [vmem:[%s326_s18] sm:$0xff]  ;;  %v440_v48 = vld [vmem:[#allocation4 + $0x70] sm:$0xff] }
  0x4e   : > { %761 = vmatpush3.bf16.msra.mxu0 %v760_v14  ;;  %783 = vmatprep.subr.bf16.mxu1 %v913_v0  ;;  %v796_v46 = vpack.c.bf16 %v439_v44, %v438_v43  ;;  %v441_v49 = vld [vmem:[#allocation4 + $0x78] sm:$0xff]  ;;  %v642_v51 = vld [vmem:[%s1094_s2] ss:$0 sm:$0xff] }
  0x4f   : > { %762 = vmatprep.subr.bf16.mxu0 %v913_v0  ;;  %v799_v50 = vpack.c.bf16 %v441_v49, %v440_v48  ;;  %v643_v56 = vld [vmem:[%s1096_s4] ss:$0 sm:$0xff] }
  0x50   : > { %v644_v63 = vld [vmem:[%s1099_s7] ss:$0 sm:$0xff] }
  0x51   : > { %785 = vmatpush3.bf16.msra.mxu1 %v784_v24  ;;  %v645_v7 = vld [vmem:[%s1097_s5] ss:$0 sm:$0xff] }
  0x52   : > { %764 = vmatpush3.bf16.msra.mxu0 %v763_v21  ;;  %786 = vmatprep.subr.bf16.mxu1 %v913_v0  ;;  %v646_v9 = vld [vmem:[%s1098_s6] ss:$0 sm:$0xff] }
  0x53   : > { %765 = vmatprep.subr.bf16.mxu0 %v913_v0 }
  0x55   : > { %788 = vmatpush3.bf16.msra.mxu1 %v787_v30 }
  0x56   : > { %767 = vmatpush3.bf16.msra.mxu0 %v766_v27  ;;  %789 = vmatprep.subr.bf16.mxu1 %v913_v0 }
  0x57   : > { %768 = vmatprep.subr.bf16.mxu0 %v913_v0 }
  0x59   : > { %791 = vmatpush3.bf16.msra.mxu1 %v790_v36 }
  0x5a   : > { %770 = vmatpush3.bf16.msra.mxu0 %v769_v33  ;;  %792 = vmatprep.subr.bf16.mxu1 %v913_v0 }
  0x5b   : > { %771 = vmatprep.subr.bf16.mxu0 %v913_v0 }
  0x5d   : > { %794 = vmatpush3.bf16.msra.mxu1 %v793_v42 }
  0x5e   : > { %773 = vmatpush3.bf16.msra.mxu0 %v772_v39  ;;  %795 = vmatprep.subr.bf16.mxu1 %v913_v0 }
  0x5f   : > { %774 = vmatprep.subr.bf16.mxu0 %v913_v0 }
  0x61   : > { %797 = vmatpush3.bf16.msra.mxu1 %v796_v46 }
  0x62   : > { %776 = vmatpush3.bf16.msra.mxu0 %v775_v45  ;;  %798 = vmatprep.subr.bf16.mxu1 %v913_v0 }
  0x65   : > { %716 = vmatmul.mubr.f32.vlgmr.msra.gmra.mrb[0].mxu0 %v331_v47  ;;  %800 = vmatpush3.bf16.msra.mxu1 %v799_v50 }
 0x138   : > { %v421_v52 = vpop.f32.mrb[0].mxu0 }
 0x139   : > { %v422_v53 = vadd.f32 %v642_v51, %v421_v52  ;;  %v717_v54 = vpop.f32.mrb[1].mxu0 }
 0x13b   : > { %v425_v55 = vmax.f32 %v422_v53, 0.0 }
 0x13d   : > { %751 = vmatmul.mubr.f32.vlgmr.msra.gmra.mrb[0].mxu1 %v425_v55 }
 0x210   : > { %v515_v57 = vpop.f32.mrb[0].mxu1 }
 0x211   : > { %v516_v58 = vadd.f32 %v643_v56, %v515_v57  ;;  %v752_v59 = vpop.f32.mrb[1].mxu1 }
 0x213   : > { %v519_v60 = vadd.f32 %v516_v58, %v331_v47 }
 0x215   : > { %520 = vadd.xlane.f32.xlu0 %v519_v60 }
 0x2a2   : > { %v521_v61 = vpop.xlane.xlu0 %520 }
 0x2a3   : > { %v522_v62 = vmul.f32 0.03125, %v521_v61 }
 0x2a5   : > { %v523_v0 = vsub.f32 %v519_v60, %v522_v62 }
 0x2a7   : > { %v531_v1 = vmul.f32 %v644_v63, %v523_v0 }
 0x2a9   : > { %v532_v2 = vmul.f32 %v531_v1, %v531_v1 }
 0x2ab   : > { %533 = vadd.xlane.f32.xlu0 %v532_v2 }
 0x338   : > { %v534_v3 = vpop.xlane.xlu0 %533 }
 0x339   : > { %v535_v4 = vmul.f32 0.03125, %v534_v3 }
 0x33b   : > { %v536_v5 = vadd.f32 1e-05, %v535_v4 }
 0x33d   : > { %835 = vrsqrt.f32 %v536_v5 }
 0x347   : > { %v836_v6 = vpop.eup %835 }
 0x348   : > { %v538_v8 = vmul.f32 %v836_v6, %v531_v1 }
 0x34a   : > { %v546_v10 = vmul.f32 %v645_v7, %v538_v8 }
 0x34c   : > { %v554_v11 = vadd.f32 %v646_v9, %v546_v10 }
 0x34e   : > { %555 = vst [vmem:[%s330_s15] sm:$0xff] %v554_v11 }
 0x34f PF: > { %s20_s27 = sadd.s32 1, %s907_s27  }
 0x350   : > { %p17_p9 = scmp.ge.s32.totalorder %s20_s27, 4  }
 0x352   :  { %19 = sbr.rel (!%p17_p9) target bundleno = 2 (0x2), region = 91 }
 0x359   :  { %575 = vsyncpa [#allocation3], 1 }
 0x35a   :  { %577 = vsyncpa [#allocation3 + $0x1], 1 }
 0x35b   :  { %578 = vsyncpa [#allocation5], 1 }

</bundles_post_ra>
